<compile_context>
chip_gen: v7x
topology: tpu7x:2x2x1
jax: 0.10.0
libtpu: 0.0.40
codegen_flags: <defaults>
</compile_context>

<pallas_src>
import functools

import jax
import jax.numpy as jnp
from jax import lax
from jax.experimental import pallas as pl
from jax.experimental.pallas import tpu as pltpu


def _conv1d_vertical_kernel(x_ref, w_ref, o_ref, *, K, W, pad, H, Hp):
    # x_ref: (Nb, C_in, Hp*W)  flat spatial; Hp = H_out rows (zero rows appended
    #                          in the wrapper when K is even), unpadded along H.
    # w_ref: (K, C_out, C_in)  per-tap weight slabs.
    # o_ref: (Nb, C_out, Hp*W)
    Nb = x_ref.shape[0]
    HWp = Hp * W

    # Within-image flat spatial index, used for the H-edge masks (no int div:
    # comparing the flat index against whole-row boundaries is equivalent).
    flat = lax.broadcasted_iota(jnp.int32, (1, HWp), 1)

    # Per-tap edge masks (None when the tap is fully in range).  Hoisted out
    # of the batch loop; JAX does not CSE broadcasts inside loops.
    masks = []
    for kh in range(K):
        lo = pad - kh          # need  h + kh - pad >= 0   <=>  h >= lo
        hi = H + pad - kh      # need  h + kh - pad <  H   <=>  h <  hi
        conds = []
        if lo > 0:
            conds.append(flat >= lo * W)
        if hi < Hp:
            conds.append(flat < hi * W)
        m = None
        if conds:
            m = conds[0]
            for c in conds[1:]:
                m = m & c
        masks.append(m)

    # Resident weight slabs (tiny).
    ws = [w_ref[kh] for kh in range(K)]

    for n in range(Nb):                       # Nb is small and static (<= 8)
        x_n = x_ref[n]                        # (C_in, Hp*W)
        acc = jnp.zeros((o_ref.shape[1], HWp), jnp.float32)
        for kh in range(K):
            # Tap kh of output row h reads input row (h + kh - pad): realize it
            # as a whole-row lane rotation (XLU), then zero the out-of-range
            # rows (the rotation wrap-around falls exactly in the masked rows).
            shift = ((pad - kh) * W) % HWp
            xs = pltpu.roll(x_n, shift=shift, axis=1) if shift else x_n
            if masks[kh] is not None:
                xs = jnp.where(masks[kh], xs, 0)
            acc = acc + jnp.dot(ws[kh], xs, preferred_element_type=jnp.float32)
        o_ref[n] = acc.astype(o_ref.dtype)


def _round_up(a, b):
    return (a + b - 1) // b * b


def _pick_batch_block(n, max_nb=8):
    """Largest Nb (<= max_nb) dividing N while keeping >= 2 grid steps (dual-TC)."""
    if n <= 1:
        return 1
    best = 1
    for d in range(1, min(n, max_nb) + 1):
        if n % d == 0 and n // d >= 2:
            best = d
    return best


def _vmem_capacity_bytes():
    try:
        cap = getattr(pltpu.get_tpu_info(), "vmem_capacity_bytes", None)
        if cap:
            return int(cap)
    except Exception:
        pass
    return 64 * 2**20  # conservative fallback (v7x per-TensorCore VMEM)


def conv1d_vertical(x_nchw, weight_oik1):
    """x_nchw: [N, C_in, H, W]; weight_oik1: [C_out, C_in, K, 1] (PyTorch Conv2d layout)."""
    N, C_in, H, W = x_nchw.shape
    C_out, c_in_w, K, kw1 = weight_oik1.shape
    assert c_in_w == C_in and kw1 == 1
    pad = K // 2
    H_out = H + 2 * pad - K + 1       # == H for odd K, H + 1 for even K
    Hp = H_out

    x = x_nchw
    if Hp > H:                        # even K: append zero rows (tiny, one-off)
        x = jnp.pad(x, ((0, 0), (0, 0), (0, Hp - H), (0, 0)))
    x_flat = x.reshape(N, C_in, Hp * W)              # free flatten onto lane axis

    # (C_out, C_in, K, 1) -> (K, C_out, C_in): per-tap weight slabs (tiny relayout).
    w_k = jnp.transpose(weight_oik1[..., 0], (2, 0, 1))

    Nb = _pick_batch_block(N)
    grid = (N // Nb,)

    # Explicit VMEM footprint: double-buffered in/out/weight blocks, the
    # rolled/masked per-tap temporaries and the f32 accumulators, plus slack.
    itemsize = jnp.dtype(x_nchw.dtype).itemsize
    hwp_pad = _round_up(Hp * W, 128)
    x_blk = Nb * _round_up(C_in, 8) * hwp_pad * itemsize
    o_blk = Nb * _round_up(C_out, 8) * hwp_pad * itemsize
    w_blk = K * _round_up(C_out, 8) * _round_up(C_in, 128) * itemsize
    acc_blk = Nb * _round_up(C_out, 8) * hwp_pad * 4
    need = 2 * x_blk + 2 * o_blk + 2 * w_blk + 3 * x_blk + acc_blk + (1 << 20)

    cap = _vmem_capacity_bytes()
    soft_cap = int(0.6 * cap)                 # headroom for compiler scratch / spill
    vmem_limit = min(max(need, 16 * 2**20), soft_cap)
    vmem_limit = min(max(vmem_limit, need), cap)

    kernel = functools.partial(_conv1d_vertical_kernel, K=K, W=W, pad=pad, H=H, Hp=Hp)

    out_flat = pl.pallas_call(
        kernel,
        out_shape=jax.ShapeDtypeStruct((N, C_out, Hp * W), x_nchw.dtype),
        grid_spec=pltpu.PrefetchScalarGridSpec(
            num_scalar_prefetch=0,
            grid=grid,
            in_specs=[
                pl.BlockSpec((Nb, C_in, Hp * W), lambda g: (g, 0, 0)),
                pl.BlockSpec((K, C_out, C_in), lambda g: (0, 0, 0)),   # resident weight
            ],
            out_specs=pl.BlockSpec((Nb, C_out, Hp * W), lambda g: (g, 0, 0)),
        ),
        compiler_params=pltpu.CompilerParams(
            dimension_semantics=("parallel",),
            vmem_limit_bytes=int(vmem_limit),
        ),
    )(x_flat, w_k)

    # Free bitcast reshape back to NCHW.
    return out_flat.reshape(N, C_out, H_out, W)


if __name__ == "__main__":
    # Small shapes consistent with the module's forward (NCHW conv input).
    N, C_in, C_out, H, W, K = 2, 4, 8, 16, 16, 3

    key = jax.random.PRNGKey(0)
    kx, kw = jax.random.split(key)
    x = jax.random.normal(kx, (N, C_in, H, W), dtype=jnp.float32)
    # PyTorch Conv2d layout [C_out, C_in, K, 1].
    weight = jax.random.normal(kw, (C_out, C_in, K, 1), dtype=jnp.float32) * 0.1

    out = jax.block_until_ready(conv1d_vertical(x, weight))

    # Reference: XLA conv with the same semantics as the PyTorch module.
    ref = lax.conv_general_dilated(
        x, weight,
        window_strides=(1, 1),
        padding=((K // 2, K // 2), (0, 0)),
        dimension_numbers=("NCHW", "OIHW", "NCHW"),
    )
    assert out.shape == ref.shape, (out.shape, ref.shape)
    # Tolerance allows for MXU matmul rounding differences vs. XLA's conv path.
    assert jnp.allclose(out, ref, atol=1e-3, rtol=1e-3), float(jnp.max(jnp.abs(out - ref)))

    print("KERNEL_OK")
</pallas_src>

<mosaic_0001>
module attributes {stable_mosaic.version = 11 : i64} {
  func.func @_conv1d_vertical_kernel(%arg0: i32, %arg1: memref<1x4x256xf32, #tpu.memory_space<vmem>>, %arg2: memref<3x8x4xf32, #tpu.memory_space<vmem>>, %arg3: memref<1x8x256xf32, #tpu.memory_space<vmem>>) attributes {dimension_semantics = [#tpu.dimension_semantics<parallel>], iteration_bounds = array<i64: 2>, scalar_prefetch = 0 : i64, scratch_operands = 0 : i64, tpu.core_type = #tpu.core_type<tc>, window_params = [{transform_indices = @transform_0, window_bounds = array<i64: 1, 4, 256>}, {pipeline_mode = #tpu.pipeline_mode<synchronous>, transform_indices = @transform_1, window_bounds = array<i64: 3, 8, 4>}, {transform_indices = @transform_2, window_bounds = array<i64: 1, 8, 256>}]} {
    %0 = tpu.iota {dimensions = array<i32: 1>} : vector<1x256xi32>
    %c16_i32 = arith.constant 16 : i32
    %1 = vector.broadcast %c16_i32 : i32 to vector<1x256xi32>
    %2 = arith.cmpi sge, %0, %1 : vector<1x256xi32>
    %c240_i32 = arith.constant 240 : i32
    %3 = vector.broadcast %c240_i32 : i32 to vector<1x256xi32>
    %4 = arith.cmpi slt, %0, %3 : vector<1x256xi32>
    %c0 = arith.constant 0 : index
    %c0_0 = arith.constant 0 : index
    %c0_1 = arith.constant 0 : index
    %5 = vector.load %arg2[%c0, %c0_0, %c0_1] : memref<3x8x4xf32, #tpu.memory_space<vmem>>, vector<1x8x4xf32>
    %6 = vector.shape_cast %5 : vector<1x8x4xf32> to vector<8x4xf32>
    %c1 = arith.constant 1 : index
    %c0_2 = arith.constant 0 : index
    %c0_3 = arith.constant 0 : index
    %7 = vector.load %arg2[%c1, %c0_2, %c0_3] : memref<3x8x4xf32, #tpu.memory_space<vmem>>, vector<1x8x4xf32>
    %8 = vector.shape_cast %7 : vector<1x8x4xf32> to vector<8x4xf32>
    %c2 = arith.constant 2 : index
    %c0_4 = arith.constant 0 : index
    %c0_5 = arith.constant 0 : index
    %9 = vector.load %arg2[%c2, %c0_4, %c0_5] : memref<3x8x4xf32, #tpu.memory_space<vmem>>, vector<1x8x4xf32>
    %10 = vector.shape_cast %9 : vector<1x8x4xf32> to vector<8x4xf32>
    %c0_6 = arith.constant 0 : index
    %c0_7 = arith.constant 0 : index
    %c0_8 = arith.constant 0 : index
    %11 = vector.load %arg1[%c0_6, %c0_7, %c0_8] : memref<1x4x256xf32, #tpu.memory_space<vmem>>, vector<1x4x256xf32>
    %12 = vector.shape_cast %11 : vector<1x4x256xf32> to vector<4x256xf32>
    %cst = arith.constant 0.000000e+00 : f32
    %13 = vector.broadcast %cst : f32 to vector<8x256xf32>
    %c16_i32_9 = arith.constant 16 : i32
    %14 = tpu.dynamic_rotate %12 by %c16_i32_9 dim 1 : vector<4x256xf32>, i32 -> vector<4x256xf32>
    %c0_i32 = arith.constant 0 : i32
    %15 = arith.sitofp %c0_i32 : i32 to f32
    %16 = vector.shape_cast %2 : vector<1x256xi1> to vector<1x256xi1>
    %17 = vector.broadcast %16 : vector<1x256xi1> to vector<4x256xi1>
    %18 = vector.broadcast %15 : f32 to vector<4x256xf32>
    %19 = arith.select %17, %14, %18 : vector<4x256xi1>, vector<4x256xf32>
    %cst_10 = arith.constant dense<0.000000e+00> : vector<8x256xf32>
    %20 = tpu.matmul %6, %19, %cst_10 {dimension_numbers = #tpu.dot_dimension_numbers<[1], [0], [0], [1], [0, 0, 1, 1], [], []>} : vector<8x4xf32>, vector<4x256xf32>, vector<8x256xf32> -> vector<8x256xf32>
    %21 = arith.addf %13, %20 : vector<8x256xf32>
    %cst_11 = arith.constant dense<0.000000e+00> : vector<8x256xf32>
    %22 = tpu.matmul %8, %12, %cst_11 {dimension_numbers = #tpu.dot_dimension_numbers<[1], [0], [0], [1], [0, 0, 1, 1], [], []>} : vector<8x4xf32>, vector<4x256xf32>, vector<8x256xf32> -> vector<8x256xf32>
    %23 = arith.addf %21, %22 : vector<8x256xf32>
    %c240_i32_12 = arith.constant 240 : i32
    %24 = tpu.dynamic_rotate %12 by %c240_i32_12 dim 1 : vector<4x256xf32>, i32 -> vector<4x256xf32>
    %c0_i32_13 = arith.constant 0 : i32
    %25 = arith.sitofp %c0_i32_13 : i32 to f32
    %26 = vector.shape_cast %4 : vector<1x256xi1> to vector<1x256xi1>
    %27 = vector.broadcast %26 : vector<1x256xi1> to vector<4x256xi1>
    %28 = vector.broadcast %25 : f32 to vector<4x256xf32>
    %29 = arith.select %27, %24, %28 : vector<4x256xi1>, vector<4x256xf32>
    %cst_14 = arith.constant dense<0.000000e+00> : vector<8x256xf32>
    %30 = tpu.matmul %10, %29, %cst_14 {dimension_numbers = #tpu.dot_dimension_numbers<[1], [0], [0], [1], [0, 0, 1, 1], [], []>} : vector<8x4xf32>, vector<4x256xf32>, vector<8x256xf32> -> vector<8x256xf32>
    %31 = arith.addf %23, %30 : vector<8x256xf32>
    %c0_15 = arith.constant 0 : index
    %c0_16 = arith.constant 0 : index
    %c0_17 = arith.constant 0 : index
    %32 = vector.load %arg3[%c0_15, %c0_16, %c0_17] : memref<1x8x256xf32, #tpu.memory_space<vmem>>, vector<1x8x256xf32>
    %33 = vector.shape_cast %32 : vector<1x8x256xf32> to vector<8x256xf32>
    %34 = vector.shape_cast %31 : vector<8x256xf32> to vector<1x8x256xf32>
    tpu.vector_store %arg3[%c0_15, %c0_16, %c0_17], %34 {strides = array<i32>} : memref<1x8x256xf32, #tpu.memory_space<vmem>>, vector<1x8x256xf32>,
    return
  }
  func.func @transform_0(%arg0: i32) -> (i32, i32, i32) {
    %c0_i32 = arith.constant 0 : i32
    %c0_i32_0 = arith.constant 0 : i32
    %c0_i32_1 = arith.constant 0 : i32
    return %arg0, %c0_i32, %c0_i32_0 : i32, i32, i32
  }
  func.func @transform_1(%arg0: i32) -> (i32, i32, i32) {
    %c0_i32 = arith.constant 0 : i32
    %c0_i32_0 = arith.constant 0 : i32
    %c0_i32_1 = arith.constant 0 : i32
    %c0_i32_2 = arith.constant 0 : i32
    return %c0_i32, %c0_i32_0, %c0_i32_1 : i32, i32, i32
  }
  func.func @transform_2(%arg0: i32) -> (i32, i32, i32) {
    %c0_i32 = arith.constant 0 : i32
    %c0_i32_0 = arith.constant 0 : i32
    %c0_i32_1 = arith.constant 0 : i32
    return %arg0, %c0_i32, %c0_i32_0 : i32, i32, i32
  }
}

</mosaic_0001>

<bundles_post_ra>
// kernel: tpu_custom_call.1
= control target key start
LH: loop header
LB: loop body
LE: loop exit
PB: predicated region body
PF: predicated region fallthrough
CT: control target
= control target key end

     0   :  { %7 = vsyncpa [#allocation3], 0  ;;  %s775_s0 = inlined_call_operand.vmem [shape: f32[2,4,256], index: 0, kind: input, shape index: {}]   ;;  %s776_s1 = inlined_call_operand.vmem [shape: f32[3,8,4], index: 1, kind: input, shape index: {}]   ;;  %s777_s2 = inlined_call_operand.hbm [shape: f32[2,8,256], index: 2, kind: output, shape index: {}]  }
   0x1   :  { %9 = vsyncpa [#allocation3 + $0x1], 0  ;;  %s657_s9 = smov 0   ;;  %s659_s10 = smov 0  }
   0x2   :  { %s661_s11 = smov 0   ;;  %s663_s12 = smov 0  }
   0x3 LB: > { %s678_s13 = sadd.s32 4294967295, %s636_s12   ;;  %s502_s14 = sadd.s32 4294967294, %s636_s12   ;;  %s636_s12 = sphi %s663_s12, %s783_s12   ;;  %s632_s11 = sphi %s661_s11, %s782_s11   ;;  %s628_s10 = sphi %s659_s10, %s781_s10   ;;  %s624_s9 = sphi %s657_s9, %s780_s9  }
   0x4   : > { %s682_s15 = sadd.s32 1, %s636_s12   ;;  %s69_s16 = sadd.s32 1, %s632_s11 }
   0x5   : > { %s66_s17 = ssub.s32 %s636_s12, %s682_s15  ;;  %p79_p0 = scmp.ne.s32.totalorder %s632_s11, %s628_s10 }
   0x6   : > { %p67_p1 = scmp.eq.s32.totalorder %s66_s17, 0  ;;  %p80_p2 = scmp.eq.s32.totalorder %s678_s13, 1 }
   0x7   : > { %p85_p3 = scmp.ne.s32.totalorder %s628_s10, %s624_s9  ;;  %p86_p4 = scmp.eq.s32.totalorder %s502_s14, 1 }
   0x8   : > { %s693_s18 = scalar_select %p67_p1, %s632_s11, %s69_s16  }
   0x9   : > { %p695_p5 = por %p80_p2, %p79_p0  ;;  %p699_p6 = por %p86_p4, %p85_p3 }
   0xa   : > { %p505_p7 = scmp.ge.s32.totalorder %s636_s12, 1  ;;  %p115_p8 = scmp.lt.s32.totalorder %s636_s12, 3 }
   0xc   : > { %p116_p9 = pnand %p505_p7, %p115_p8 }
   0xd   : > { %p137_p10 = scmp.lt.s32.totalorder (!%p116_p9), %s678_s13, 1  ;;  %v638_v0 = vmov (!%p116_p9), 0.0   ;;  %s639_s26 = smov (!%p116_p9), 112   ;;  %vm175_vm0 = vcmask (!%p116_p9), 1043456   ;;  %v509_v3 = vld [vmem:[%s776_s1 + $0x8] sm:$0xff] (!%p116_p9)  ;;  %vm171_vm1 = vcmask (!%p116_p9), 31744   ;;  %v142_v4 = vlaneseq (!%p116_p9) }
   0xe   : > { %119 = sbr.rel (%p116_p9) target bundleno = 385 (0x181), region = 28  ;;  %324 = vmatprep.mubr.f32.mxu0 (!%p116_p9), %v638_v0  ;;  %244 = vmatprep.mubr.f32.mxu1 (!%p116_p9), %v638_v0  ;;  %s640_s27 = smov (!%p116_p9), 16   ;;  %v149_v14 = vld [vmem:[%s776_s1] sm:$0xff] (!%p116_p9)  ;;  %v510_v18 = vld [vmem:[%s776_s1 + $0x10] sm:$0xff] (!%p116_p9) }
   0xf   : > { %v143_v5 = vand.u32 (!%p116_p9), 127, %v142_v4  ;;  %s134_s6 = sand.u32 (!%p116_p9), 1, %s628_s10   ;;  %s526_s8 = sshll.u32 (!%p116_p9), %s678_s13, 8 }
  0x10   : > { %s506_s7 = sshll.u32 (!%p116_p9), %s134_s6, 4  ;;  %s429_s23 = scalar_lea.sflag (!%p116_p9), [#allocation3], %s134_s6 }
  0x11   : > { %v144_v6 = vadd.s32 (!%p116_p9), 128, %v143_v5  ;;  %vm335_vm2 = vcmp.lt.s32.totalorder (!%p116_p9), %v143_v5, 112  ;;  %vm162_vm3 = vcmp.lt.s32.totalorder (!%p116_p9), %v143_v5, 16  ;;  %vm145_vm5 = vcmp.ge.s32.totalorder (!%p116_p9), %v143_v5, 16  ;;  %s136_s14 = scalar_lea.vmem (!%p116_p9), [#allocation2], %s506_s7  ;;  %s641_s24 = smov (!%p116_p9), [#allocation2]  }
  0x12   : > { %s443_s16 = sshll.u32 (!%p116_p9), %s136_s14, 4  ;;  %s735_s16 = int_to_ptr.vmem [resolvable:$true] %s443_s16 }
  0x13   : > { %vm148_vm4 = vcmp.lt.s32.totalorder (!%p116_p9), %v144_v6, 240 }
  0x15   : > { %s138_s21 = scalar_select %p137_p10, %s678_s13, 1 }
  0x16   : > { %s574_s13 = scalar_lea.vmem %s735_s16, 256 }
  0x17   : > { %s525_s22 = sshll.u32 %s138_s21, 3  ;;  %p575_p11 = scmp.ne.s32.totalorder %s735_s16, %s574_s13 }
  0x18   : > { %s141_s25 = scalar_lea.vmem %s775_s0, %s525_s22  ;;  %s733_s22 = scalar_lea.hbm %s777_s2, %s526_s8 }
  0x19   : > { %v154_v1 = vld [vmem:[%s141_s25] sm:$0xff]  ;;  %p576_p12 = pnand %p575_p11, %p695_p5  ;;  %s578_s25 = sshll.u32 %s641_s24, 4  ;;  %s579_s25 = int_to_ptr.vmem [resolvable:$false] %s578_s25 }
  0x1a   : > { %331 = vrot.lane.b32.xlu1 %v154_v1, %s639_s26  ;;  %158 = vrot.lane.b32.xlu0 %v154_v1, %s640_s27  ;;  %v156_v2 = vcombine.high %v154_v1, %v154_v1  ;;  %p581_p0 = scmp.lt.s32.totalorder %s735_s16, %s579_s25 }
  0x1b   : > { %p577_p13 = pneg %p576_p12 }
  0x1c   : > { %511 = vmatprep.subr.msk.mxu1 %vm175_vm0, %v156_v2 }
  0x1d   : > { %512 = vmatpush1.msk.msra.mxu1 %vm175_vm0, %v154_v1 }
  0x1e   : > { %333 = vrot.lane.b32.xlu1 %v156_v2, %s639_s26  ;;  %160 = vrot.lane.b32.xlu0 %v156_v2, %s640_s27  ;;  %s580_s26 = scalar_lea.vmem %s579_s25, 512 }
  0x1f   : > { %513 = vmatmul.mubr.msk.f32.vlgmr.msra.gmra.mrb[0].mxu1 %vm171_vm1, %v509_v3  ;;  %p582_p1 = scmp.lt.s32.totalorder %s580_s26, %s574_s13 }
  0x21   : > { %p583_p2 = por %p582_p1, %p581_p0 }
  0x23   : > { %p584_p3 = pnand %p583_p2, %p577_p13 }
  0x8c   : > { %v332_v7 = vpop.permute.xlu1 %331  ;;  %v159_v8 = vpop.permute.xlu0 %158 }
  0x90   : > { %v334_v9 = vpop.permute.xlu1 %333  ;;  %v161_v10 = vpop.permute.xlu0 %160 }
  0x91   : > { %v337_v11 = vsel %vm335_vm2, %v334_v9, %v332_v7  ;;  %v164_v12 = vsel %vm162_vm3, %v161_v10, %v159_v8  ;;  %v163_v13 = vsel %vm162_vm3, %v159_v8, %v161_v10  ;;  %v336_v15 = vsel %vm335_vm2, %v332_v7, %v334_v9 }
  0x92   : > { %v343_v16 = vsel %vm148_vm4, %v337_v11, 0.0  ;;  %514 = vmatprep.subr.msk.mxu0 %vm175_vm0, %v163_v13  ;;  %v169_v17 = vsel %vm145_vm5, %v164_v12, 0.0 }
  0x93   : > { %515 = vmatpush1.msk.msra.mxu0 %vm175_vm0, %v169_v17 }
  0x94   : > { %516 = vmatmul.mubr.msk.f32.vlgmr.msra.gmra.mrb[0].mxu0 %vm171_vm1, %v149_v14  ;;  %517 = vmatprep.subr.msk.mxu0 %vm175_vm0, %v343_v16 }
  0x95   : > { %518 = vmatpush1.msk.msra.mxu0 %vm175_vm0, %v336_v15  ;;  %417 = vmatprep.mubr.f32.mxu0 %v638_v0 }
  0x9c   : > { %519 = vmatmul.mubr.msk.f32.vlgmr.msra.gmra.mrb[0].mxu0 %vm171_vm1, %v510_v18 }
  0xf2   : > { %v246_v19 = vpop.f32.mrb[0].mxu1 }
  0xf3   : > { %v248_v20 = vpop.f32.mrb[1].mxu1 }
 0x16f   : > { %v419_v21 = vpop.f32.mrb[0].mxu0 }
 0x170   : > { %v527_v22 = vadd.f32 %v419_v21, %v246_v19  ;;  %v421_v23 = vpop.f32.mrb[1].mxu0 }
 0x171   : > { %v528_v24 = vadd.f32 %v421_v23, %v248_v20 }
 0x172   : > { %426 = vst [vmem:[%s136_s14] sm:$0xff] %v527_v22 }
 0x173   : > { %427 = vst [vmem:[%s136_s14 + $0x8] sm:$0xff] %v528_v24 }
 0x174   : > { %587 = shalt.err (!%p584_p3)
}
 0x175   : > { %s588_s27 = scalar_lea.hbm %s733_s22, 256  ;;  %s592_s30 = scalar_lea.hbm %s777_s2, 512 }
 0x176   : > { %p589_p4 = scmp.ne.s32.totalorder %s733_s22, %s588_s27  ;;  %p593_p9 = scmp.lt.u32.totalorder %s733_s22, %s777_s2 }
 0x177   : > { %p594_p10 = scmp.lt.u32.totalorder %s592_s30, %s588_s27  ;;  %p596_p12 = scmp.lt.u32.totalorder %s588_s27, %s733_s22 }
 0x178   : > { %p590_p7 = pnand %p589_p4, %p695_p5 }
 0x179   : > { %p595_p11 = por %p594_p10, %p593_p9 }
 0x17a   : > { %p591_p8 = pneg %p590_p7 }
 0x17b   : > { %p597_p13 = por %p596_p12, %p595_p11 }
 0x17d   : > { %p598_p0 = pnand %p597_p13, %p591_p8 }
 0x17f   : > { %601 = shalt.err (!%p598_p0)
}
 0x180   : > { %531 = dma.vmem_to_hbm [thread:$0]  (%p695_p5), %s735_s16, 256, %s733_s22, %s429_s23  }
 0x181 PF: > { %p537_p1 = scmp.ge.s32.totalorder %s636_s12, 2  ;;  %s455_s5 = sand.u32 1, %s624_s9  }
 0x182   : > { %s456_s6 = scalar_lea.sflag [#allocation3], %s455_s5 }
 0x183   : > { %p534_p2 = pnand %p537_p1, %p699_p6 }
 0x185   : > { %619 = dma.done.wait (!%p534_p2), %s456_s6, 256  }
 0x186   : > { %621 = vsyncadd (!%p534_p2), %s456_s6, 4294967040  ;;  %p12_p3 = scmp.ge.s32.totalorder %s682_s15, 4   ;;  %s780_s9 = smov %s628_s10 }
 0x187   : > { %s781_s10 = smov %s632_s11  ;;  %s782_s11 = smov %s693_s18 }
 0x188   : > { %s783_s12 = smov %s682_s15  ;;  %14 = sbr.rel (!%p12_p3) target bundleno = 3 (0x3), region = 65 }
 0x18f   :  { %461 = vsyncpa [#allocation3], 1 }
 0x190   :  { %463 = vsyncpa [#allocation3 + $0x1], 1 }

</bundles_post_ra>
